<compile_context>
chip_gen: v7x
topology: tpu7x:2x2x1
jax: 0.10.0
libtpu: 0.0.40
codegen_flags: <defaults>
</compile_context>

<pallas_src>
import functools
import numpy as np
import jax
import jax.numpy as jnp
from jax import lax
from jax.experimental import pallas as pl
from jax.experimental.pallas import tpu as pltpu

PRIMES = [73856093, 19349663, 83492791, 49979687, 97755331, 13623469,
          31912469, 2654435761]


def _primes_i32(d):
    """Low 32 bits of the primes, reinterpreted as int32 (two's complement)."""
    out = []
    for p in PRIMES[:d]:
        q = p & 0xFFFFFFFF
        if q >= (1 << 31):
            q -= (1 << 32)
        out.append(q)
    return out


def hash_weight_kernel(x_ref, ids_ref, wts_ref, *, input_dim, resolution,
                       hashmap_size):
    """Vectorized corner hashing + trilinear weights (lane-dense over points).

    x_ref:   (D, tile_n) f32 coords in [-1, 1] (transposed, points on lanes)
    ids_ref: (2^D, tile_n) int32 hashed table row per corner
    wts_ref: (2^D, tile_n) f32 trilinear weight per corner
    """
    xs = (x_ref[...] + 1.0) * 0.5 * jnp.float32(resolution)   # (D, TN)
    xi = xs.astype(jnp.int32)                                  # trunc == floor (xs >= 0)
    xf = xs - xi.astype(jnp.float32)

    primes = _primes_i32(input_dim)
    mask = jnp.int32(hashmap_size - 1)                         # % T (T power of two)

    # Per-dimension precompute, reused by all 2^D corners.
    term, wgt = [], []
    for d in range(input_dim):
        xi_d = xi[d:d + 1, :]
        xf_d = xf[d:d + 1, :]
        p = jnp.int32(primes[d])
        term.append((xi_d * p, (xi_d + 1) * p))                # bit==0 / bit==1
        wgt.append((1.0 - xf_d, xf_d))

    id_rows, wt_rows = [], []
    for c in range(1 << input_dim):                            # static unroll
        h, w = None, None
        for d in range(input_dim):
            hi = (c >> d) & 1                                  # 0 -> binary_mask true
            h = term[d][hi] if h is None else h ^ term[d][hi]
            w = wgt[d][hi] if w is None else w * wgt[d][hi]
        id_rows.append(h & mask)
        wt_rows.append(w)

    # Single dense (2^D, tile_n) store per output.
    ids_ref[...] = jnp.concatenate(id_rows, axis=0)
    wts_ref[...] = jnp.concatenate(wt_rows, axis=0)


def gather_kernel(ids_ref, wts_ref, emb_ref, o_ref):
    """Gather + weighted corner sum against a VMEM-resident table.

    ids_ref: (2^D, N_pad) int32 in SMEM (scalar-addressable)
    wts_ref: (2^D, N_pad) f32   in SMEM
    emb_ref: (T//8, 8, F) f32 table, resident in VMEM (constant block index)
    o_ref:   (tile_n//8, 8, F) f32 output block (points grouped by 8 sublanes)
    """
    n_corners = ids_ref.shape[0]
    n_groups, _, n_feat = o_ref.shape
    tile_n = n_groups * 8
    base = pl.program_id(0) * tile_n
    sub_iota = lax.broadcasted_iota(jnp.int32, (8, n_feat), 0)  # hoisted

    def group_body(g, carry):
        rows = []
        for p in range(8):                                      # static unroll
            j = base + g * 8 + p                                # absolute point index
            acc = jnp.zeros((8, n_feat), jnp.float32)
            for c in range(n_corners):                          # static unroll
                idx = ids_ref[c, j]                             # SMEM scalar
                w = wts_ref[c, j]                               # SMEM scalar
                tile = emb_ref[idx >> 3]                        # (8, F) dyn leading idx
                acc = acc + jnp.where(sub_iota == (idx & 7), tile, 0.0) * w
            rows.append(jnp.sum(acc, axis=0, keepdims=True))    # (1, F)
        o_ref[g] = jnp.concatenate(rows, axis=0)                # (8, F)
        return carry

    lax.fori_loop(0, n_groups, group_body, 0)


def grid_forward(x, emb, *, input_dim, resolution, hashmap_size, tile_n=256):
    assert hashmap_size >= 8 and (hashmap_size & (hashmap_size - 1)) == 0, \
        "hashmap_size must be a power of 2 (>= 8)"
    assert tile_n % 128 == 0
    batch_shape = x.shape[:-1]
    d = x.shape[-1]
    assert d == input_dim and input_dim <= len(PRIMES)
    n_features = emb.shape[1]
    n_corners = 1 << input_dim

    n = int(np.prod(batch_shape)) if batch_shape else 1
    n_tiles = pl.cdiv(n, tile_n)
    if n_tiles > 1 and n_tiles % 2 == 1:
        n_tiles += 1                      # keep both v7x TensorCores busy
    n_pad = n_tiles * tile_n

    xf = x.reshape(n, d).astype(jnp.float32)
    if n_pad != n:
        xf = jnp.pad(xf, ((0, n_pad - n), (0, 0)))
    xt = xf.T                             # (D, n_pad): points on lanes

    # ---- kernel 1: vectorized corner hashes + weights -----------------------
    hash_fn = functools.partial(hash_weight_kernel, input_dim=input_dim,
                                resolution=float(resolution),
                                hashmap_size=hashmap_size)
    ids, wts = pl.pallas_call(
        hash_fn,
        out_shape=(jax.ShapeDtypeStruct((n_corners, n_pad), jnp.int32),
                   jax.ShapeDtypeStruct((n_corners, n_pad), jnp.float32)),
        grid_spec=pltpu.PrefetchScalarGridSpec(
            num_scalar_prefetch=0,
            grid=(n_tiles,),
            in_specs=[pl.BlockSpec((d, tile_n), lambda i: (0, i))],
            out_specs=[pl.BlockSpec((n_corners, tile_n), lambda i: (0, i)),
                       pl.BlockSpec((n_corners, tile_n), lambda i: (0, i))]),
        compiler_params=pltpu.CompilerParams(
            dimension_semantics=("parallel",)),
    )(xt)

    # ---- kernel 2: gather against VMEM-resident table ------------------------
    # Table as (T//8, 8, F): dynamic indexing only on the untiled leading dim.
    # (For a static table, emb3 could be hoisted out of the per-call path.)
    table_groups = hashmap_size // 8
    emb3 = emb.astype(jnp.float32).reshape(table_groups, 8, n_features)

    lane_pad = ((n_features + 127) // 128) * 128
    table_pad_bytes = table_groups * 8 * lane_pad * 4
    out_pad_bytes = (tile_n // 8) * 8 * lane_pad * 4
    vmem_limit = int(min(max(2 * table_pad_bytes + 2 * out_pad_bytes + 4 * 2**20,
                             16 * 2**20),
                         96 * 2**20))    # v7x note: physical ceiling is 64 MiB

    out3 = pl.pallas_call(
        gather_kernel,
        out_shape=jax.ShapeDtypeStruct((n_pad // 8, 8, n_features), jnp.float32),
        grid_spec=pltpu.PrefetchScalarGridSpec(
            num_scalar_prefetch=0,
            grid=(n_tiles,),
            in_specs=[
                pl.BlockSpec(memory_space=pltpu.MemorySpace.SMEM),   # ids
                pl.BlockSpec(memory_space=pltpu.MemorySpace.SMEM),   # weights
                pl.BlockSpec((table_groups, 8, n_features),
                             lambda i: (0, 0, 0)),                   # resident table
            ],
            out_specs=pl.BlockSpec((tile_n // 8, 8, n_features),
                                   lambda i: (i, 0, 0))),
        compiler_params=pltpu.CompilerParams(
            dimension_semantics=("parallel",),
            vmem_limit_bytes=vmem_limit),
    )(ids, wts, emb3)

    out = out3.reshape(n_pad, n_features)[:n]
    return out.reshape(*batch_shape, n_features)


def ref_forward(x, emb, *, input_dim, resolution, hashmap_size):
    """NumPy int64 reference mirroring the PyTorch module exactly."""
    x = np.asarray(x, np.float32)
    emb = np.asarray(emb, np.float32)
    xs = ((x + np.float32(1.0)) / np.float32(2.0)) * np.float32(resolution)
    x_i = np.trunc(xs).astype(np.int64)
    x_f = (xs - x_i.astype(np.float32)).astype(np.float32)

    d = input_dim
    neighbors = np.arange(1 << d, dtype=np.int64).reshape(-1, 1)
    dims = np.arange(d, dtype=np.int64).reshape(1, -1)
    mask = (neighbors & (1 << dims)) == 0           # (2^D, D)

    x_i = x_i[..., None, :]
    x_f = x_f[..., None, :]
    indices = np.where(mask, x_i, x_i + 1)
    weights = np.where(mask, np.float32(1.0) - x_f, x_f)
    weight = np.prod(weights, axis=-1, keepdims=True)

    primes = np.array(PRIMES, dtype=np.int64)
    hashed = indices[..., 0] * primes[0]
    for i in range(1, d):
        hashed ^= indices[..., i] * primes[i]
    ids = hashed % hashmap_size
    neighbor_data = emb[ids]
    return np.sum(neighbor_data * weight.astype(np.float32), axis=-2)


if __name__ == "__main__":
    input_dim = 3
    n_features = 4
    hashmap_size = 1024        # power of two ("typically power of 2" per module)
    resolution = 16.0

    key = jax.random.PRNGKey(0)
    k1, k2 = jax.random.split(key)
    # coordinates in [-1, 1], small batch: (2, 8, 3)
    x = jax.random.uniform(k1, (2, 8, input_dim), jnp.float32,
                           minval=-1.0, maxval=1.0)
    # deterministic init matching nn.init.uniform_(-1e-4, 1e-4)
    emb = jax.random.uniform(k2, (hashmap_size, n_features), jnp.float32,
                             minval=-0.0001, maxval=0.0001)

    out = grid_forward(x, emb, input_dim=input_dim, resolution=resolution,
                       hashmap_size=hashmap_size)
    out = jax.block_until_ready(out)

    ref = ref_forward(np.asarray(x), np.asarray(emb), input_dim=input_dim,
                      resolution=resolution, hashmap_size=hashmap_size)
    assert out.shape == (2, 8, n_features)
    np.testing.assert_allclose(np.asarray(out), ref, rtol=1e-5, atol=1e-8)
    print("KERNEL_OK")
</pallas_src>

<mosaic_0001>
module attributes {stable_mosaic.version = 11 : i64} {
  func.func @hash_weight_kernel(%arg0: i32, %arg1: memref<3x256xf32, #tpu.memory_space<vmem>>, %arg2: memref<8x256xi32, #tpu.memory_space<vmem>>, %arg3: memref<8x256xf32, #tpu.memory_space<vmem>>) attributes {dimension_semantics = [#tpu.dimension_semantics<parallel>], iteration_bounds = array<i64: 1>, scalar_prefetch = 0 : i64, scratch_operands = 0 : i64, tpu.core_type = #tpu.core_type<tc>, window_params = [{transform_indices = @transform_0, window_bounds = array<i64: 3, 256>}, {transform_indices = @transform_1, window_bounds = array<i64: 8, 256>}, {transform_indices = @transform_2, window_bounds = array<i64: 8, 256>}]} {
    %c0 = arith.constant 0 : index
    %c0_0 = arith.constant 0 : index
    %0 = vector.load %arg1[%c0, %c0_0] : memref<3x256xf32, #tpu.memory_space<vmem>>, vector<3x256xf32>
    %cst = arith.constant 1.000000e+00 : f32
    %1 = vector.broadcast %cst : f32 to vector<3x256xf32>
    %2 = arith.addf %0, %1 : vector<3x256xf32>
    %cst_1 = arith.constant 5.000000e-01 : f32
    %3 = vector.broadcast %cst_1 : f32 to vector<3x256xf32>
    %4 = arith.mulf %2, %3 : vector<3x256xf32>
    %cst_2 = arith.constant 1.600000e+01 : f32
    %5 = vector.broadcast %cst_2 : f32 to vector<3x256xf32>
    %6 = arith.mulf %4, %5 : vector<3x256xf32>
    %7 = arith.fptosi %6 : vector<3x256xf32> to vector<3x256xi32>
    %8 = arith.sitofp %7 : vector<3x256xi32> to vector<3x256xf32>
    %9 = arith.subf %6, %8 : vector<3x256xf32>
    %10 = vector.extract_strided_slice %7 {offsets = [0, 0], sizes = [1, 256], strides = [1, 1]} : vector<3x256xi32> to vector<1x256xi32>
    %11 = vector.extract_strided_slice %9 {offsets = [0, 0], sizes = [1, 256], strides = [1, 1]} : vector<3x256xf32> to vector<1x256xf32>
    %c73856093_i32 = arith.constant 73856093 : i32
    %12 = vector.broadcast %c73856093_i32 : i32 to vector<1x256xi32>
    %13 = arith.muli %10, %12 : vector<1x256xi32>
    %c1_i32 = arith.constant 1 : i32
    %14 = vector.broadcast %c1_i32 : i32 to vector<1x256xi32>
    %15 = arith.addi %10, %14 : vector<1x256xi32>
    %c73856093_i32_3 = arith.constant 73856093 : i32
    %16 = vector.broadcast %c73856093_i32_3 : i32 to vector<1x256xi32>
    %17 = arith.muli %15, %16 : vector<1x256xi32>
    %cst_4 = arith.constant 1.000000e+00 : f32
    %18 = vector.broadcast %cst_4 : f32 to vector<1x256xf32>
    %19 = arith.subf %18, %11 : vector<1x256xf32>
    %20 = vector.extract_strided_slice %7 {offsets = [1, 0], sizes = [1, 256], strides = [1, 1]} : vector<3x256xi32> to vector<1x256xi32>
    %21 = vector.extract_strided_slice %9 {offsets = [1, 0], sizes = [1, 256], strides = [1, 1]} : vector<3x256xf32> to vector<1x256xf32>
    %c19349663_i32 = arith.constant 19349663 : i32
    %22 = vector.broadcast %c19349663_i32 : i32 to vector<1x256xi32>
    %23 = arith.muli %20, %22 : vector<1x256xi32>
    %c1_i32_5 = arith.constant 1 : i32
    %24 = vector.broadcast %c1_i32_5 : i32 to vector<1x256xi32>
    %25 = arith.addi %20, %24 : vector<1x256xi32>
    %c19349663_i32_6 = arith.constant 19349663 : i32
    %26 = vector.broadcast %c19349663_i32_6 : i32 to vector<1x256xi32>
    %27 = arith.muli %25, %26 : vector<1x256xi32>
    %cst_7 = arith.constant 1.000000e+00 : f32
    %28 = vector.broadcast %cst_7 : f32 to vector<1x256xf32>
    %29 = arith.subf %28, %21 : vector<1x256xf32>
    %30 = vector.extract_strided_slice %7 {offsets = [2, 0], sizes = [1, 256], strides = [1, 1]} : vector<3x256xi32> to vector<1x256xi32>
    %31 = vector.extract_strided_slice %9 {offsets = [2, 0], sizes = [1, 256], strides = [1, 1]} : vector<3x256xf32> to vector<1x256xf32>
    %c83492791_i32 = arith.constant 83492791 : i32
    %32 = vector.broadcast %c83492791_i32 : i32 to vector<1x256xi32>
    %33 = arith.muli %30, %32 : vector<1x256xi32>
    %c1_i32_8 = arith.constant 1 : i32
    %34 = vector.broadcast %c1_i32_8 : i32 to vector<1x256xi32>
    %35 = arith.addi %30, %34 : vector<1x256xi32>
    %c83492791_i32_9 = arith.constant 83492791 : i32
    %36 = vector.broadcast %c83492791_i32_9 : i32 to vector<1x256xi32>
    %37 = arith.muli %35, %36 : vector<1x256xi32>
    %cst_10 = arith.constant 1.000000e+00 : f32
    %38 = vector.broadcast %cst_10 : f32 to vector<1x256xf32>
    %39 = arith.subf %38, %31 : vector<1x256xf32>
    %40 = arith.xori %13, %23 : vector<1x256xi32>
    %41 = arith.mulf %19, %29 : vector<1x256xf32>
    %42 = arith.xori %40, %33 : vector<1x256xi32>
    %43 = arith.mulf %41, %39 : vector<1x256xf32>
    %c1023_i32 = arith.constant 1023 : i32
    %44 = vector.broadcast %c1023_i32 : i32 to vector<1x256xi32>
    %45 = arith.andi %42, %44 : vector<1x256xi32>
    %46 = arith.xori %17, %23 : vector<1x256xi32>
    %47 = arith.mulf %11, %29 : vector<1x256xf32>
    %48 = arith.xori %46, %33 : vector<1x256xi32>
    %49 = arith.mulf %47, %39 : vector<1x256xf32>
    %c1023_i32_11 = arith.constant 1023 : i32
    %50 = vector.broadcast %c1023_i32_11 : i32 to vector<1x256xi32>
    %51 = arith.andi %48, %50 : vector<1x256xi32>
    %52 = arith.xori %13, %27 : vector<1x256xi32>
    %53 = arith.mulf %19, %21 : vector<1x256xf32>
    %54 = arith.xori %52, %33 : vector<1x256xi32>
    %55 = arith.mulf %53, %39 : vector<1x256xf32>
    %c1023_i32_12 = arith.constant 1023 : i32
    %56 = vector.broadcast %c1023_i32_12 : i32 to vector<1x256xi32>
    %57 = arith.andi %54, %56 : vector<1x256xi32>
    %58 = arith.xori %17, %27 : vector<1x256xi32>
    %59 = arith.mulf %11, %21 : vector<1x256xf32>
    %60 = arith.xori %58, %33 : vector<1x256xi32>
    %61 = arith.mulf %59, %39 : vector<1x256xf32>
    %c1023_i32_13 = arith.constant 1023 : i32
    %62 = vector.broadcast %c1023_i32_13 : i32 to vector<1x256xi32>
    %63 = arith.andi %60, %62 : vector<1x256xi32>
    %64 = arith.xori %13, %23 : vector<1x256xi32>
    %65 = arith.mulf %19, %29 : vector<1x256xf32>
    %66 = arith.xori %64, %37 : vector<1x256xi32>
    %67 = arith.mulf %65, %31 : vector<1x256xf32>
    %c1023_i32_14 = arith.constant 1023 : i32
    %68 = vector.broadcast %c1023_i32_14 : i32 to vector<1x256xi32>
    %69 = arith.andi %66, %68 : vector<1x256xi32>
    %70 = arith.xori %17, %23 : vector<1x256xi32>
    %71 = arith.mulf %11, %29 : vector<1x256xf32>
    %72 = arith.xori %70, %37 : vector<1x256xi32>
    %73 = arith.mulf %71, %31 : vector<1x256xf32>
    %c1023_i32_15 = arith.constant 1023 : i32
    %74 = vector.broadcast %c1023_i32_15 : i32 to vector<1x256xi32>
    %75 = arith.andi %72, %74 : vector<1x256xi32>
    %76 = arith.xori %13, %27 : vector<1x256xi32>
    %77 = arith.mulf %19, %21 : vector<1x256xf32>
    %78 = arith.xori %76, %37 : vector<1x256xi32>
    %79 = arith.mulf %77, %31 : vector<1x256xf32>
    %c1023_i32_16 = arith.constant 1023 : i32
    %80 = vector.broadcast %c1023_i32_16 : i32 to vector<1x256xi32>
    %81 = arith.andi %78, %80 : vector<1x256xi32>
    %82 = arith.xori %17, %27 : vector<1x256xi32>
    %83 = arith.mulf %11, %21 : vector<1x256xf32>
    %84 = arith.xori %82, %37 : vector<1x256xi32>
    %85 = arith.mulf %83, %31 : vector<1x256xf32>
    %c1023_i32_17 = arith.constant 1023 : i32
    %86 = vector.broadcast %c1023_i32_17 : i32 to vector<1x256xi32>
    %87 = arith.andi %84, %86 : vector<1x256xi32>
    %88 = tpu.concatenate %45, %51, %57, %63, %69, %75, %81, %87 in 0 : vector<1x256xi32>, vector<1x256xi32>, vector<1x256xi32>, vector<1x256xi32>, vector<1x256xi32>, vector<1x256xi32>, vector<1x256xi32>, vector<1x256xi32> -> vector<8x256xi32>
    %c0_18 = arith.constant 0 : index
    %c0_19 = arith.constant 0 : index
    %89 = vector.load %arg2[%c0_18, %c0_19] : memref<8x256xi32, #tpu.memory_space<vmem>>, vector<8x256xi32>
    tpu.vector_store %arg2[%c0_18, %c0_19], %88 {strides = array<i32>} : memref<8x256xi32, #tpu.memory_space<vmem>>, vector<8x256xi32>,
    %90 = tpu.concatenate %43, %49, %55, %61, %67, %73, %79, %85 in 0 : vector<1x256xf32>, vector<1x256xf32>, vector<1x256xf32>, vector<1x256xf32>, vector<1x256xf32>, vector<1x256xf32>, vector<1x256xf32>, vector<1x256xf32> -> vector<8x256xf32>
    %c0_20 = arith.constant 0 : index
    %c0_21 = arith.constant 0 : index
    %91 = vector.load %arg3[%c0_20, %c0_21] : memref<8x256xf32, #tpu.memory_space<vmem>>, vector<8x256xf32>
    tpu.vector_store %arg3[%c0_20, %c0_21], %90 {strides = array<i32>} : memref<8x256xf32, #tpu.memory_space<vmem>>, vector<8x256xf32>,
    return
  }
  func.func @transform_0(%arg0: i32) -> (i32, i32) {
    %c0_i32 = arith.constant 0 : i32
    %c0_i32_0 = arith.constant 0 : i32
    return %c0_i32, %arg0 : i32, i32
  }
  func.func @transform_1(%arg0: i32) -> (i32, i32) {
    %c0_i32 = arith.constant 0 : i32
    %c0_i32_0 = arith.constant 0 : i32
    return %c0_i32, %arg0 : i32, i32
  }
  func.func @transform_2(%arg0: i32) -> (i32, i32) {
    %c0_i32 = arith.constant 0 : i32
    %c0_i32_0 = arith.constant 0 : i32
    return %c0_i32, %arg0 : i32, i32
  }
}

</mosaic_0001>

<bundles_post_ra>
// kernel: tpu_custom_call.1
= control target key start
LH: loop header
LB: loop body
LE: loop exit
PB: predicated region body
PF: predicated region fallthrough
CT: control target
= control target key end

     0   :  { %8 = vsyncpa [#allocation3], 0  ;;  %s527_s0 = inlined_call_operand.hbm [shape: f32[3,256], index: 0, kind: input, shape index: {}]   ;;  %s528_s1 = inlined_call_operand.hbm [shape: s32[8,256], index: 1, kind: output, shape index: {0}]   ;;  %s529_s2 = inlined_call_operand.hbm [shape: f32[8,256], index: 2, kind: output, shape index: {1}]  }
   0x1   :  { %9 = vsyncpa [#allocation4], 0 }
   0x2   :  { %10 = vsyncpa [#allocation7], 0  ;;  %s390_s9 = smov [#allocation2]   ;;  %s318_s13 = scalar_lea.hbm %s527_s0, 128 }
   0x3   :  { %s17_s10 = sshll.u32 %s390_s9, 4  ;;  %p319_p0 = scmp.ne.s32.totalorder %s527_s0, %s318_s13  ;;  %s18_s10 = int_to_ptr.vmem [resolvable:$true] %s17_s10 }
   0x4   :  { %p322_p1 = scmp.lt.u32.totalorder %s318_s13, %s527_s0 }
   0x6   :  { %p324_p2 = pnand %p322_p1, %p319_p0 }
   0x8   :  { %327 = shalt.err (!%p324_p2)
}
   0x9   :  { %s328_s18 = scalar_lea.vmem %s18_s10, 128  ;;  %p333_p4 = scmp.lt.s32.totalorder %s18_s10, %s18_s10 }
   0xa   :  { %p329_p3 = scmp.ne.s32.totalorder %s18_s10, %s328_s18  ;;  %p334_p5 = scmp.lt.s32.totalorder %s328_s18, %s328_s18 }
   0xc   :  { %p335_p6 = por %p334_p5, %p333_p4 }
   0xe   :  { %p336_p7 = pnand %p335_p6, %p329_p3 }
  0x10   :  { %339 = shalt.err (!%p336_p7)
}
  0x11   :  { %20 = dma.hbm_to_vmem [thread:$0]  %s527_s0, 128, %s18_s10, [#allocation3]  }
  0x12   :  { %384 = dma.done.wait [#allocation3], 128  }
  0x13   :  { %385 = vsyncadd [#allocation3], 4294967168  ;;  %v24_v0 = vld [vmem:[#allocation2] sm:$0x77]  ;;  %v93_v4 = vlaneseq  ;;  %vm157_vm0 = vcmask 1040384   ;;  %vm160_vm1 = vcmask 1041408  }
  0x14   :  { %v25_v1 = vadd.f32 1.0, %v24_v0  ;;  %vm163_vm2 = vcmask 1042432   ;;  %vm166_vm3 = vcmask 1043456   ;;  %vm169_vm4 = vcmask 1044480   ;;  %s391_s0 = smov [#allocation5]  }
  0x15   :  { %v94_v7 = vshrl.u32 %v93_v4, 7  ;;  %vm172_vm5 = vcmask 1045504   ;;  %vm175_vm6 = vcmask 1046528   ;;  %s290_s21 = sshll.u32 %s391_s0, 4  ;;  %s291_s21 = int_to_ptr.vmem [resolvable:$true] %s290_s21 }
  0x16   :  { %v26_v2 = vmul.f32 0.5, %v25_v1  ;;  %s340_s22 = scalar_lea.vmem %s291_s21, 256  ;;  %p345_p9 = scmp.lt.s32.totalorder %s291_s21, %s291_s21 }
  0x17   :  { %v422_v19 = vsub.s32 0, %v94_v7  ;;  %v428_v26 = vsub.s32 4, %v94_v7  ;;  %p341_p8 = scmp.ne.s32.totalorder %s291_s21, %s340_s22  ;;  %p346_p10 = scmp.lt.s32.totalorder %s340_s22, %s340_s22 }
  0x18   :  { %v27_v3 = vmul.f32 16.0, %v26_v2 }
  0x19   :  { %p347_p11 = por %p346_p10, %p345_p9 }
  0x1a   :  { %v313_v5 = vtrunc.f32 %v27_v3 }
  0x1b   :  { %p348_p12 = pnand %p347_p11, %p341_p8 }
  0x1c   :  { %v314_v6 = vcvt.f32.s32 %v313_v5 }
  0x1e   :  { %v32_v8 = vadd.s32 1, %v314_v6  ;;  %v35_v9 = vmul.u32 19349663, %v314_v6  ;;  %v29_v10 = vcvt.s32.f32 %v314_v6  ;;  %v31_v11 = vmul.u32 73856093, %v314_v6 }
  0x1f   :  { %v37_v12 = vmul.u32 83492791, %v314_v6 }
  0x20   :  { %v33_v13 = vmul.u32 73856093, %v32_v8  ;;  %v36_v14 = vmul.u32 19349663, %v32_v8  ;;  %v39_v15 = vrot.slane %v35_v9, 5  ;;  %v420_v16 = vsub.f32 %v27_v3, %v29_v10 }
  0x21   :  { %v38_v17 = vmul.u32 83492791, %v32_v8  ;;  %v47_v18 = vrot.slane %v37_v12, 6 }
  0x22   :  { %v40_v20 = vrot.slane %v39_v15, 4  ;;  %v60_v21 = vrot.slane %v36_v14, 5  ;;  %v425_v22 = vsub.f32 1.0, %v420_v16  ;;  %v64_v23 = vrot.slane %v420_v16, 5 }
  0x23   :  { %v48_v24 = vrot.slane %v47_v18, 4  ;;  %v76_v25 = vrot.slane %v38_v17, 6  ;;  %v79_v27 = vrot.slane %v420_v16, 6 }
  0x24   :  { %v41_v28 = vxor.u32 %v40_v20, %v31_v11  ;;  %v55_v29 = vxor.u32 %v40_v20, %v33_v13  ;;  %v61_v30 = vrot.slane %v60_v21, 4  ;;  %v43_v31 = vrot.slane %v425_v22, 5 }
  0x25   :  { %v77_v32 = vrot.slane %v76_v25, 4  ;;  %v50_v33 = vrot.slane %v425_v22, 6  ;;  %v65_v34 = vrot.slane %v64_v23, 4  ;;  %v433_v35 = vrot.slane %v79_v27, 4 }
  0x26   :  { %v49_v36 = vxor.u32 %v48_v24, %v41_v28  ;;  %v57_v37 = vxor.u32 %v55_v29, %v48_v24  ;;  %v62_v38 = vxor.u32 %v61_v30, %v31_v11  ;;  %v71_v39 = vxor.u32 %v61_v30, %v33_v13 }
  0x27   :  { %v78_v40 = vxor.u32 %v77_v32, %v41_v28  ;;  %v84_v41 = vxor.u32 %v77_v32, %v55_v29  ;;  %v44_v42 = vrot.slane %v43_v31, 4  ;;  %v51_v43 = vrot.slane %v50_v33, 4 }
  0x28   :  { %v54_v44 = vand.u32 1023, %v49_v36  ;;  %v59_v45 = vand.u32 1023, %v57_v37  ;;  %v68_v46 = vxor.u32 %v62_v38, %v48_v24  ;;  %v73_v47 = vxor.u32 %v71_v39, %v48_v24 }
  0x29   :  { %v83_v48 = vand.u32 1023, %v78_v40  ;;  %v86_v49 = vand.u32 1023, %v84_v41  ;;  %v87_v50 = vxor.u32 %v77_v32, %v62_v38  ;;  %v90_v51 = vxor.u32 %v77_v32, %v71_v39 }
  0x2a   :  { %v70_v52 = vand.u32 1023, %v68_v46  ;;  %v75_v53 = vand.u32 1023, %v73_v47  ;;  %v96_v54 = vrot.slane %v54_v44, %v422_v19  ;;  %v104_v55 = vrot.slane %v59_v45, %v422_v19 }
  0x2b   :  { %v89_v56 = vand.u32 1023, %v87_v50  ;;  %v92_v57 = vand.u32 1023, %v90_v51  ;;  %v108_v58 = vrot.slane %v59_v45, %v428_v26  ;;  %v128_v59 = vrot.slane %v83_v48, %v422_v19 }
  0x2c   :  { %v112_v60 = vrot.slane %v70_v52, %v422_v19  ;;  %v120_v61 = vrot.slane %v75_v53, %v422_v19  ;;  %v136_v62 = vrot.slane %v86_v49, %v422_v19  ;;  %v158_v63 = vsel %vm157_vm0, %v96_v54, %v104_v55 }
  0x2d   :  { %v144_v0 = vrot.slane %v89_v56, %v422_v19  ;;  %v152_v1 = vrot.slane %v92_v57, %v422_v19  ;;  %v100_v2 = vrot.slane %v54_v44, %v428_v26  ;;  %v116_v3 = vrot.slane %v70_v52, %v428_v26 }
  0x2e   :  { %v161_v4 = vsel %vm160_vm1, %v158_v63, %v112_v60  ;;  %v124_v5 = vrot.slane %v75_v53, %v428_v26  ;;  %v132_v6 = vrot.slane %v83_v48, %v428_v26  ;;  %v140_v7 = vrot.slane %v86_v49, %v428_v26 }
  0x2f   :  { %v164_v8 = vsel %vm163_vm2, %v161_v4, %v120_v61  ;;  %v148_v9 = vrot.slane %v89_v56, %v428_v26  ;;  %v156_v10 = vrot.slane %v92_v57, %v428_v26  ;;  %v159_v11 = vsel %vm157_vm0, %v100_v2, %v108_v58 }
  0x30   :  { %v167_v12 = vsel %vm166_vm3, %v164_v8, %v128_v59  ;;  %v162_v13 = vsel %vm160_vm1, %v159_v11, %v116_v3  ;;  %v46_v14 = vmul.f32 %v44_v42, %v425_v22  ;;  %v56_v15 = vmul.f32 %v44_v42, %v420_v16 }
  0x31   :  { %v170_v17 = vsel %vm169_vm4, %v167_v12, %v136_v62  ;;  %v165_v18 = vsel %vm163_vm2, %v162_v13, %v124_v5  ;;  %v67_v20 = vmul.f32 %v65_v34, %v425_v22  ;;  %v72_v21 = vmul.f32 %v65_v34, %v420_v16 }
  0x32   :  { %v173_v23 = vsel %vm172_vm5, %v170_v17, %v144_v0  ;;  %v168_v24 = vsel %vm166_vm3, %v165_v18, %v132_v6  ;;  %v53_v25 = vmul.f32 %v51_v43, %v46_v14  ;;  %v58_v27 = vmul.f32 %v56_v15, %v51_v43 }
  0x33   :  { %v176_v28 = vsel %vm175_vm6, %v173_v23, %v152_v1  ;;  %v171_v29 = vsel %vm169_vm4, %v168_v24, %v140_v7  ;;  %v69_v30 = vmul.f32 %v67_v20, %v51_v43  ;;  %v74_v31 = vmul.f32 %v72_v21, %v51_v43 }
  0x34   :  { %178 = vst [vmem:[#allocation5] sm:$0xff] %v176_v28  ;;  %v174_v32 = vsel %vm172_vm5, %v171_v29, %v148_v9  ;;  %v82_v22 = vmul.f32 %v433_v35, %v46_v14  ;;  %v85_v16 = vmul.f32 %v433_v35, %v56_v15  ;;  %v88_v34 = vmul.f32 %v433_v35, %v67_v20 }
  0x35   :  { %v177_v33 = vsel %vm175_vm6, %v174_v32, %v156_v10  ;;  %v184_v36 = vrot.slane %v53_v25, %v422_v19  ;;  %v195_v37 = vrot.slane %v58_v27, %v422_v19  ;;  %v91_v38 = vmul.f32 %v433_v35, %v72_v21 }
  0x36   :  { %179 = vst [vmem:[#allocation5 + $0x8] sm:$0xff] %v177_v33  ;;  %v199_v39 = vrot.slane %v58_v27, %v428_v26  ;;  %v206_v40 = vrot.slane %v69_v30, %v422_v19  ;;  %v217_v41 = vrot.slane %v74_v31, %v422_v19  ;;  %v210_v42 = vrot.slane %v69_v30, %v428_v26 }
  0x37   :  { %v228_v43 = vrot.slane %v82_v22, %v422_v19 }
  0x38   :  { %351 = shalt.err (!%p348_p12)
}
  0x39   :  { %s352_s25 = scalar_lea.hbm %s528_s1, 256 }
  0x3a   :  { %p353_p13 = scmp.ne.s32.totalorder %s528_s1, %s352_s25  ;;  %p356_p0 = scmp.lt.u32.totalorder %s352_s25, %s528_s1 }
  0x3c   :  { %p358_p1 = pnand %p356_p0, %p353_p13 }
  0x3e   :  { %361 = shalt.err (!%p358_p1)
}
  0x3f   :  { %293 = dma.vmem_to_hbm [thread:$0]  %s291_s21, 256, %s528_s1, [#allocation4]   ;;  %v221_v35 = vrot.slane %v74_v31, %v428_v26  ;;  %v239_v44 = vrot.slane %v85_v16, %v422_v19  ;;  %v268_v45 = vsel %vm157_vm0, %v184_v36, %v195_v37  ;;  %v188_v46 = vrot.slane %v53_v25, %v428_v26 }
  0x40   :  { %v250_v47 = vrot.slane %v88_v34, %v422_v19  ;;  %v270_v48 = vsel %vm160_vm1, %v268_v45, %v206_v40  ;;  %v232_v49 = vrot.slane %v82_v22, %v428_v26  ;;  %v261_v50 = vrot.slane %v91_v38, %v422_v19  ;;  %s392_s1 = smov [#allocation6]  }
  0x41   :  { %v272_v51 = vsel %vm163_vm2, %v270_v48, %v217_v41  ;;  %v243_v52 = vrot.slane %v85_v16, %v428_v26  ;;  %v269_v53 = vsel %vm157_vm0, %v188_v46, %v199_v39  ;;  %v254_v55 = vrot.slane %v88_v34, %v428_v26  ;;  %s300_s4 = sshll.u32 %s392_s1, 4  ;;  %s301_s4 = int_to_ptr.vmem [resolvable:$true] %s300_s4 }
  0x42   :  { %v274_v54 = vsel %vm166_vm3, %v272_v51, %v228_v43  ;;  %v271_v56 = vsel %vm160_vm1, %v269_v53, %v210_v42  ;;  %v265_v58 = vrot.slane %v91_v38, %v428_v26  ;;  %s362_s5 = scalar_lea.vmem %s301_s4, 256  ;;  %p367_p3 = scmp.lt.s32.totalorder %s301_s4, %s301_s4 }
  0x43   :  { %v276_v57 = vsel %vm169_vm4, %v274_v54, %v239_v44  ;;  %v273_v59 = vsel %vm163_vm2, %v271_v56, %v221_v35  ;;  %p363_p2 = scmp.ne.s32.totalorder %s301_s4, %s362_s5  ;;  %p368_p4 = scmp.lt.s32.totalorder %s362_s5, %s362_s5 }
  0x44   :  { %v278_v19 = vsel %vm172_vm5, %v276_v57, %v250_v47  ;;  %v275_v60 = vsel %vm166_vm3, %v273_v59, %v232_v49 }
  0x45   :  { %v280_v61 = vsel %vm175_vm6, %v278_v19, %v261_v50  ;;  %v277_v62 = vsel %vm169_vm4, %v275_v60, %v243_v52  ;;  %p369_p5 = por %p368_p4, %p367_p3 }
  0x46   :  { %282 = vst [vmem:[#allocation6] sm:$0xff] %v280_v61  ;;  %v279_v63 = vsel %vm172_vm5, %v277_v62, %v254_v55 }
  0x47   :  { %v281_v0 = vsel %vm175_vm6, %v279_v63, %v265_v58  ;;  %p370_p6 = pnand %p369_p5, %p363_p2 }
  0x48   :  { %283 = vst [vmem:[#allocation6 + $0x8] sm:$0xff] %v281_v0 }
  0x49   :  { %373 = shalt.err (!%p370_p6)
}
  0x4a   :  { %s374_s8 = scalar_lea.hbm %s529_s2, 256 }
  0x4b   :  { %p375_p7 = scmp.ne.s32.totalorder %s529_s2, %s374_s8  ;;  %p378_p8 = scmp.lt.u32.totalorder %s374_s8, %s529_s2 }
  0x4d   :  { %p380_p9 = pnand %p378_p8, %p375_p7 }
  0x4f   :  { %383 = shalt.err (!%p380_p9)
}
  0x50   :  { %303 = dma.vmem_to_hbm [thread:$0]  %s301_s4, 256, %s529_s2, [#allocation7]  }
  0x51   :  { %386 = dma.done.wait [#allocation4], 256  }
  0x52   :  { %387 = vsyncadd [#allocation4], 4294967040 }
  0x53   :  { %388 = dma.done.wait [#allocation7], 256  }
  0x54   :  { %389 = vsyncadd [#allocation7], 4294967040 }
  0x55   :  { %310 = vsyncpa [#allocation3], 1 }
  0x56   :  { %311 = vsyncpa [#allocation4], 1 }
  0x57   :  { %312 = vsyncpa [#allocation7], 1 }

</bundles_post_ra>
